<compile_context>
chip_gen: v7x
topology: tpu7x:2x2x1
jax: 0.10.0
libtpu: 0.0.40
codegen_flags: <defaults>
</compile_context>

<pallas_src>
import functools

import jax
import jax.numpy as jnp
import numpy as np
from jax.experimental import pallas as pl
from jax.experimental.pallas import tpu as pltpu

EPS = 1e-5

# Slot order inside the packed (4, D, D) weight stack.
_WQ, _WO, _W1, _W2 = range(4)
# Row order inside the packed (10, D) bias / LayerNorm stack.
_LN1W, _LN1B, _BQ, _BK, _BV, _BO, _LN2W, _LN2B, _B1, _B2 = range(10)


def _layernorm(x, w, b):
    mu = jnp.mean(x, axis=-1, keepdims=True)
    var = jnp.mean((x - mu) ** 2, axis=-1, keepdims=True)
    return (x - mu) * jax.lax.rsqrt(var + EPS) * w + b


def pma_kernel(num_heads, s_ref, x_ref, w_ref, wkv_ref, v_ref, m_ref, out_ref):
    """One grid step processes G batch elements (whole MAB in one pass)."""
    bf16 = jnp.bfloat16
    f32 = jnp.float32

    Ns, D = s_ref.shape[1], s_ref.shape[2]
    G, N = x_ref.shape[0], x_ref.shape[1]
    NH = num_heads

    S = s_ref[0]                                       # (Ns, D) seeds, shared across batch
    Xf = x_ref[...].astype(f32).reshape(G * N, D)      # bf16 HBM stream -> f32 for LN math
    head_mask = m_ref[...]                             # (NH*Ns, D) block-diagonal mask, bf16

    ln1w, ln1b = v_ref[_LN1W], v_ref[_LN1B]
    bq, bk, bv, bo = v_ref[_BQ], v_ref[_BK], v_ref[_BV], v_ref[_BO]
    ln2w, ln2b = v_ref[_LN2W], v_ref[_LN2B]
    b1, b2 = v_ref[_B1], v_ref[_B2]

    # --- ln1 on Q (= seeds) and K/V source (= X); f32 VPU math -------------------
    Qn = _layernorm(S, ln1w, ln1b)                     # (Ns, D)
    Kn = _layernorm(Xf, ln1w, ln1b).astype(bf16)       # (G*N, D) bf16 MXU operand

    # --- projections: bf16 MXU inputs, f32 accumulation --------------------------
    # wq / bq carry the 1/sqrt(head_dim) attention scale (folded on the host).
    # wk|wv are fused into one (D, 2D) slab so the big (G*N)-row matmul runs once.
    Qp = jnp.dot(Qn.astype(bf16), w_ref[_WQ], preferred_element_type=f32) + bq
    KV = jnp.dot(Kn, wkv_ref[...], preferred_element_type=f32)            # (G*N, 2D)
    Kp = KV[:, :D] + bk
    Vp = KV[:, D:] + bv

    # --- multi-head attention -----------------------------------------------------
    # Query row q = h*Ns + s carries seed s masked to head h's lanes, so two batched
    # contractions over full D give per-head scores / context with no per-head loop
    # or lane slicing.  Optimal while head_dim < 128; for head_dim >= the MXU
    # contraction width, per-head batched dots would avoid NH-redundant MXU work.
    Qexp = (jnp.broadcast_to(Qp[None], (NH, Ns, D))
            .reshape(NH * Ns, D).astype(bf16)) * head_mask
    Qb = jnp.broadcast_to(Qexp[None], (G, NH * Ns, D))
    K3 = Kp.astype(bf16).reshape(G, N, D)
    V3 = Vp.astype(bf16).reshape(G, N, D)

    sc = jnp.einsum("gqd,gkd->gqk", Qb, K3, preferred_element_type=f32)   # (G, NH*Ns, N)
    mx = jnp.max(sc, axis=-1, keepdims=True)
    ex = jnp.exp(sc - mx)
    probs = ex * pl.reciprocal(jnp.sum(ex, axis=-1, keepdims=True), approx=True)

    ctx_all = jnp.einsum("gqk,gkd->gqd", probs.astype(bf16), V3,
                         preferred_element_type=f32)                      # (G, NH*Ns, D)
    # Keep each row's own head lanes, then sum heads: sublane-aligned VPU adds
    # (Ns is padded to a multiple of 8 on the host).
    ctx = jnp.sum((ctx_all * head_mask).reshape(G, NH, Ns, D), axis=1)
    ctx = ctx.reshape(G * Ns, D)                                          # (G*Ns, D)

    # --- out_proj + residual + ln2 + FFN + residual --------------------------------
    attn = jnp.dot(ctx.astype(bf16), w_ref[_WO], preferred_element_type=f32) + bo
    Srep = jnp.broadcast_to(S[None], (G, Ns, D)).reshape(G * Ns, D)
    H = Srep + attn
    Hn = _layernorm(H, ln2w, ln2b)
    f = jnp.maximum(
        jnp.dot(Hn.astype(bf16), w_ref[_W1], preferred_element_type=f32) + b1, 0.0)
    f = jnp.dot(f.astype(bf16), w_ref[_W2], preferred_element_type=f32) + b2
    out_ref[...] = (H + f).reshape(G, Ns, D).astype(out_ref.dtype)


def _pack_params(params, num_heads, num_seeds_pad):
    """Consolidate the parameter tensors into 4 packed arrays; fold the QK scale."""
    D = params["wq"].shape[0]
    hd = D // num_heads
    scale = 1.0 / float(np.sqrt(hd))

    # Weights are pre-transposed for x @ W and shipped as bf16 (MXU-native; halves
    # weight DMA / VMEM).  wk|wv are fused into a single (D, 2D) slab.
    w_stack = jnp.stack([
        params["wq"] * scale,          # 1/sqrt(head_dim) folded into the Q projection
        params["wo"], params["w1"], params["w2"],
    ]).astype(jnp.bfloat16)
    w_kv = jnp.concatenate([params["wk"], params["wv"]], axis=1).astype(jnp.bfloat16)

    # Ten (1, D) bias / LayerNorm rows packed into one f32 array.
    v_stack = jnp.concatenate([
        params["ln1_w"], params["ln1_b"],
        params["bq"] * scale, params["bk"], params["bv"], params["bo"],
        params["ln2_w"], params["ln2_b"],
        params["b1"], params["b2"],
    ], axis=0).astype(jnp.float32)

    # Block-diagonal head mask (bf16): row q = h*Ns_pad + s keeps only head h's lanes.
    q_head = np.arange(num_heads * num_seeds_pad)[:, None] // num_seeds_pad
    d_head = np.arange(D)[None, :] // hd
    head_mask = jnp.asarray((q_head == d_head).astype(np.float32)).astype(jnp.bfloat16)

    return w_stack, w_kv, v_stack, head_mask


def _vmem_capacity_bytes():
    try:
        info = pltpu.get_tpu_info()
        cap = int(getattr(info, "vmem_capacity_bytes", 0))
        if cap > 0:
            return cap
    except Exception:
        pass
    return 64 * 1024 * 1024          # conservative fallback: v7x per-TensorCore VMEM


def _per_group_bytes(N, Ns, D, NH):
    """Approximate VMEM bytes that scale with the batch-group size G."""
    x_blk = 2 * N * D * 2                              # double-buffered bf16 X block
    out_blk = 2 * Ns * D * 4                           # double-buffered f32 output block
    proj = 10 * N * D * 4                              # Kn / fused KV / Kp / Vp / bf16 copies
    attn = 4 * NH * Ns * N * 4 + 3 * NH * Ns * D * 4   # scores / probs + context slabs
    tail = 6 * Ns * D * 4                              # H, Hn, FFN temporaries
    return x_blk + out_blk + proj + attn + tail


def _fixed_bytes(Ns, D, NH):
    """Approximate VMEM bytes for the grid-constant operands (double-buffered)."""
    return (2 * 6 * D * D * 2          # bf16 weight stacks (4xDxD + Dx2D)
            + 2 * 10 * D * 4           # bias / LN rows
            + 2 * NH * Ns * D * 2      # head mask (bf16)
            + 2 * Ns * D * 4)          # seeds


def _pick_group(B, g_cap):
    """Largest group size <= g_cap, preferring divisors of B (no host-side pad)."""
    g_cap = max(1, min(B, g_cap))
    best_div = max(d for d in range(1, g_cap + 1) if B % d == 0)
    if 2 * best_div >= g_cap:
        return best_div, False
    return g_cap, True


def pma_forward(X, params, num_heads, batch_block=None, vmem_limit_bytes=None):
    B, N, D = X.shape
    assert D % num_heads == 0
    S = params["S"]
    Ns = S.shape[1]
    # Pad the seed count to a sublane multiple so every per-head slab is 8-aligned.
    Ns_pad = ((Ns + 7) // 8) * 8
    if Ns_pad != Ns:
        S = jnp.concatenate([S, jnp.zeros((1, Ns_pad - Ns, D), S.dtype)], axis=1)

    w_stack, w_kv, v_stack, head_mask = _pack_params(params, num_heads, Ns_pad)

    # X is the dominant HBM stream: ship it in bf16 (halves DMA + VMEM); the kernel
    # upcasts to f32 before LayerNorm.
    Xb = X.astype(jnp.bfloat16)

    cap = _vmem_capacity_bytes()
    per_g = _per_group_bytes(N, Ns_pad, D, num_heads)
    fixed = _fixed_bytes(Ns_pad, D, num_heads)

    if batch_block is None:
        budget = max(per_g, int(0.6 * cap) - fixed)
        g_cap = max(1, budget // per_g)
        if B >= 2:
            g_cap = min(g_cap, -(-B // 2))   # keep >= 2 grid steps (v7x has 2 TCs)
        G, needs_pad = _pick_group(B, g_cap)
    else:
        G = max(1, min(B, batch_block))
        needs_pad = (B % G) != 0

    Bp = ((B + G - 1) // G) * G
    if needs_pad and Bp != B:
        # Fallback only: padding costs an extra HBM pass over X, so _pick_group
        # prefers divisors of B.
        Xb = jnp.concatenate([Xb, jnp.zeros((Bp - B, N, D), Xb.dtype)], axis=0)

    if vmem_limit_bytes is None:
        need = fixed + G * per_g
        vmem_limit_bytes = int(min(0.9 * cap, max(2 * need, 32 * 1024 * 1024)))

    NH = num_heads
    cost = pl.CostEstimate(
        flops=int(B * (4 * N * D * D + 4 * NH * Ns_pad * N * D + 8 * Ns_pad * D * D)),
        transcendentals=int(B * (NH * Ns_pad * N + N + 2 * Ns_pad)),
        bytes_accessed=int(B * N * D * 2 + B * Ns_pad * D * 4
                           + 6 * D * D * 2 + (10 + NH * Ns_pad) * D * 4),
    )

    out = pl.pallas_call(
        functools.partial(pma_kernel, num_heads),
        out_shape=jax.ShapeDtypeStruct((Bp, Ns_pad, D), jnp.float32),
        grid=(Bp // G,),
        in_specs=[
            pl.BlockSpec((1, Ns_pad, D), lambda b: (0, 0, 0)),        # seeds (grid-constant)
            pl.BlockSpec((G, N, D), lambda b: (b, 0, 0)),             # X (bf16), G elems/step
            pl.BlockSpec((4, D, D), lambda b: (0, 0, 0)),             # wq/wo/w1/w2 (bf16)
            pl.BlockSpec((D, 2 * D), lambda b: (0, 0)),               # fused wk|wv (bf16)
            pl.BlockSpec((10, D), lambda b: (0, 0)),                  # biases / LayerNorm (f32)
            pl.BlockSpec((num_heads * Ns_pad, D), lambda b: (0, 0)),  # head mask (bf16)
        ],
        out_specs=pl.BlockSpec((G, Ns_pad, D), lambda b: (b, 0, 0)),
        compiler_params=pltpu.CompilerParams(
            dimension_semantics=("parallel",),
            vmem_limit_bytes=vmem_limit_bytes),
        cost_estimate=cost,
    )(S, Xb, w_stack, w_kv, v_stack, head_mask)
    return out[:B, :Ns]


def pma_reference(X, p, num_heads):
    """Pure-JAX f32 reference mirroring the PyTorch PMA/MAB forward pass."""
    B, N, D = X.shape
    S = jnp.tile(p["S"], (B, 1, 1))
    Ns = S.shape[1]
    hd = D // num_heads

    def ln(x, w, b):
        mu = x.mean(-1, keepdims=True)
        var = ((x - mu) ** 2).mean(-1, keepdims=True)
        return (x - mu) / jnp.sqrt(var + EPS) * w + b

    Qn = ln(S, p["ln1_w"], p["ln1_b"])
    Kn = ln(X, p["ln1_w"], p["ln1_b"])
    Qp = Qn @ p["wq"] + p["bq"]
    Kp = Kn @ p["wk"] + p["bk"]
    Vp = Kn @ p["wv"] + p["bv"]
    Qh = Qp.reshape(B, Ns, num_heads, hd).transpose(0, 2, 1, 3)
    Kh = Kp.reshape(B, N, num_heads, hd).transpose(0, 2, 1, 3)
    Vh = Vp.reshape(B, N, num_heads, hd).transpose(0, 2, 1, 3)
    sc = jnp.einsum("bhqd,bhkd->bhqk", Qh, Kh) / jnp.sqrt(hd)
    a = jax.nn.softmax(sc, axis=-1)
    ctx = jnp.einsum("bhqk,bhkd->bhqd", a, Vh).transpose(0, 2, 1, 3).reshape(B, Ns, D)
    attn = ctx @ p["wo"] + p["bo"]
    H = S + attn
    Hn = ln(H, p["ln2_w"], p["ln2_b"])
    f = jnp.maximum(Hn @ p["w1"] + p["b1"], 0.0) @ p["w2"] + p["b2"]
    return H + f


def init_params(key, dim, num_seeds):
    """Deterministic synthetic parameter init (shapes follow the nn.Module)."""
    ks = jax.random.split(key, 12)
    std = 0.1
    # nn.MultiheadAttention in_proj_weight is (3D, D); split & pre-transpose so
    # the kernel computes x @ W (== x @ W_torch^T).
    in_proj_w = jax.random.normal(ks[0], (3 * dim, dim), jnp.float32) * std
    in_proj_b = jax.random.normal(ks[1], (3 * dim,), jnp.float32) * std
    return {
        "S": jax.random.normal(ks[2], (1, num_seeds, dim), jnp.float32),
        "ln1_w": jnp.ones((1, dim), jnp.float32),
        "ln1_b": jnp.zeros((1, dim), jnp.float32),
        "wq": in_proj_w[:dim].T,
        "wk": in_proj_w[dim:2 * dim].T,
        "wv": in_proj_w[2 * dim:].T,
        "bq": in_proj_b[:dim].reshape(1, dim),
        "bk": in_proj_b[dim:2 * dim].reshape(1, dim),
        "bv": in_proj_b[2 * dim:].reshape(1, dim),
        "wo": (jax.random.normal(ks[3], (dim, dim), jnp.float32) * std).T,
        "bo": (jax.random.normal(ks[4], (dim,), jnp.float32) * std).reshape(1, dim),
        "ln2_w": jnp.ones((1, dim), jnp.float32),
        "ln2_b": jnp.zeros((1, dim), jnp.float32),
        "w1": (jax.random.normal(ks[5], (dim, dim), jnp.float32) * std).T,
        "b1": (jax.random.normal(ks[6], (dim,), jnp.float32) * std).reshape(1, dim),
        "w2": (jax.random.normal(ks[7], (dim, dim), jnp.float32) * std).T,
        "b2": (jax.random.normal(ks[8], (dim,), jnp.float32) * std).reshape(1, dim),
    }


if __name__ == "__main__":
    B, N, D = 2, 16, 32          # batch, set size, embedding dim
    num_heads, num_seeds = 4, 8

    key = jax.random.PRNGKey(0)
    kx, kp = jax.random.split(key)
    X = jax.random.normal(kx, (B, N, D), jnp.float32)
    params = init_params(kp, D, num_seeds)

    out = pma_forward(X, params, num_heads)
    out = jax.block_until_ready(out)

    ref = pma_reference(X, params, num_heads)
    ref = jax.block_until_ready(ref)

    assert out.shape == (B, num_seeds, D)
    # bf16 X / MXU inputs + approx reciprocal => looser tolerance vs. f32 reference.
    assert np.allclose(np.asarray(out), np.asarray(ref), atol=5e-2, rtol=5e-2), (
        "pallas output does not match reference")
    print("KERNEL_OK")
</pallas_src>

<mosaic_0001>
module attributes {stable_mosaic.version = 11 : i64} {
  func.func @pma_kernel(%arg0: i32, %arg1: memref<1x8x32xf32, #tpu.memory_space<vmem>>, %arg2: memref<1x16x32xbf16, #tpu.memory_space<vmem>>, %arg3: memref<4x32x32xbf16, #tpu.memory_space<vmem>>, %arg4: memref<32x64xbf16, #tpu.memory_space<vmem>>, %arg5: memref<10x32xf32, #tpu.memory_space<vmem>>, %arg6: memref<32x32xbf16, #tpu.memory_space<vmem>>, %arg7: memref<1x8x32xf32, #tpu.memory_space<vmem>>) attributes {dimension_semantics = [#tpu.dimension_semantics<parallel>], iteration_bounds = array<i64: 2>, scalar_prefetch = 0 : i64, scratch_operands = 0 : i64, tpu.core_type = #tpu.core_type<tc>, window_params = [{pipeline_mode = #tpu.pipeline_mode<synchronous>, transform_indices = @transform_0, window_bounds = array<i64: 1, 8, 32>}, {transform_indices = @transform_1, window_bounds = array<i64: 1, 16, 32>}, {pipeline_mode = #tpu.pipeline_mode<synchronous>, transform_indices = @transform_2, window_bounds = array<i64: 4, 32, 32>}, {pipeline_mode = #tpu.pipeline_mode<synchronous>, transform_indices = @transform_3, window_bounds = array<i64: 32, 64>}, {pipeline_mode = #tpu.pipeline_mode<synchronous>, transform_indices = @transform_4, window_bounds = array<i64: 10, 32>}, {pipeline_mode = #tpu.pipeline_mode<synchronous>, transform_indices = @transform_5, window_bounds = array<i64: 32, 32>}, {transform_indices = @transform_6, window_bounds = array<i64: 1, 8, 32>}]} {
    %c0 = arith.constant 0 : index
    %c0_0 = arith.constant 0 : index
    %c0_1 = arith.constant 0 : index
    %0 = vector.load %arg1[%c0, %c0_0, %c0_1] : memref<1x8x32xf32, #tpu.memory_space<vmem>>, vector<1x8x32xf32>
    %1 = vector.shape_cast %0 : vector<1x8x32xf32> to vector<8x32xf32>
    %c0_2 = arith.constant 0 : index
    %c0_3 = arith.constant 0 : index
    %c0_4 = arith.constant 0 : index
    %2 = vector.load %arg2[%c0_2, %c0_3, %c0_4] : memref<1x16x32xbf16, #tpu.memory_space<vmem>>, vector<1x16x32xbf16>
    %3 = arith.extf %2 : vector<1x16x32xbf16> to vector<1x16x32xf32>
    %4 = vector.shape_cast %3 : vector<1x16x32xf32> to vector<16x32xf32>
    %c0_5 = arith.constant 0 : index
    %c0_6 = arith.constant 0 : index
    %5 = vector.load %arg6[%c0_5, %c0_6] : memref<32x32xbf16, #tpu.memory_space<vmem>>, vector<32x32xbf16>
    %c0_7 = arith.constant 0 : index
    %c0_8 = arith.constant 0 : index
    %6 = vector.load %arg5[%c0_7, %c0_8] : memref<10x32xf32, #tpu.memory_space<vmem>>, vector<1x32xf32>
    %7 = vector.shape_cast %6 : vector<1x32xf32> to vector<32xf32>
    %c1 = arith.constant 1 : index
    %c0_9 = arith.constant 0 : index
    %8 = vector.load %arg5[%c1, %c0_9] : memref<10x32xf32, #tpu.memory_space<vmem>>, vector<1x32xf32>
    %9 = vector.shape_cast %8 : vector<1x32xf32> to vector<32xf32>
    %c2 = arith.constant 2 : index
    %c0_10 = arith.constant 0 : index
    %10 = vector.load %arg5[%c2, %c0_10] : memref<10x32xf32, #tpu.memory_space<vmem>>, vector<1x32xf32>
    %11 = vector.shape_cast %10 : vector<1x32xf32> to vector<32xf32>
    %c3 = arith.constant 3 : index
    %c0_11 = arith.constant 0 : index
    %12 = vector.load %arg5[%c3, %c0_11] : memref<10x32xf32, #tpu.memory_space<vmem>>, vector<1x32xf32>
    %13 = vector.shape_cast %12 : vector<1x32xf32> to vector<32xf32>
    %c4 = arith.constant 4 : index
    %c0_12 = arith.constant 0 : index
    %14 = vector.load %arg5[%c4, %c0_12] : memref<10x32xf32, #tpu.memory_space<vmem>>, vector<1x32xf32>
    %15 = vector.shape_cast %14 : vector<1x32xf32> to vector<32xf32>
    %c5 = arith.constant 5 : index
    %c0_13 = arith.constant 0 : index
    %16 = vector.load %arg5[%c5, %c0_13] : memref<10x32xf32, #tpu.memory_space<vmem>>, vector<1x32xf32>
    %17 = vector.shape_cast %16 : vector<1x32xf32> to vector<32xf32>
    %c6 = arith.constant 6 : index
    %c0_14 = arith.constant 0 : index
    %18 = vector.load %arg5[%c6, %c0_14] : memref<10x32xf32, #tpu.memory_space<vmem>>, vector<1x32xf32>
    %19 = vector.shape_cast %18 : vector<1x32xf32> to vector<32xf32>
    %c7 = arith.constant 7 : index
    %c0_15 = arith.constant 0 : index
    %20 = vector.load %arg5[%c7, %c0_15] : memref<10x32xf32, #tpu.memory_space<vmem>>, vector<1x32xf32>
    %21 = vector.shape_cast %20 : vector<1x32xf32> to vector<32xf32>
    %c8 = arith.constant 8 : index
    %c0_16 = arith.constant 0 : index
    %22 = vector.load %arg5[%c8, %c0_16] : memref<10x32xf32, #tpu.memory_space<vmem>>, vector<1x32xf32>
    %23 = vector.shape_cast %22 : vector<1x32xf32> to vector<32xf32>
    %c9 = arith.constant 9 : index
    %c0_17 = arith.constant 0 : index
    %24 = vector.load %arg5[%c9, %c0_17] : memref<10x32xf32, #tpu.memory_space<vmem>>, vector<1x32xf32>
    %25 = vector.shape_cast %24 : vector<1x32xf32> to vector<32xf32>
    %cst = arith.constant dense<0.000000e+00> : vector<8xf32>
    %26 = vector.multi_reduction <add>, %1, %cst [1] : vector<8x32xf32> to vector<8xf32>
    %27 = vector.shape_cast %26 : vector<8xf32> to vector<8x1xf32>
    %cst_18 = arith.constant 3.200000e+01 : f32
    %28 = vector.broadcast %cst_18 : f32 to vector<8x1xf32>
    %29 = arith.divf %27, %28 : vector<8x1xf32>
    %30 = vector.broadcast %29 : vector<8x1xf32> to vector<8x32xf32>
    %31 = arith.subf %1, %30 : vector<8x32xf32>
    %32 = arith.mulf %31, %31 : vector<8x32xf32>
    %cst_19 = arith.constant dense<0.000000e+00> : vector<8xf32>
    %33 = vector.multi_reduction <add>, %32, %cst_19 [1] : vector<8x32xf32> to vector<8xf32>
    %34 = vector.shape_cast %33 : vector<8xf32> to vector<8x1xf32>
    %cst_20 = arith.constant 3.200000e+01 : f32
    %35 = vector.broadcast %cst_20 : f32 to vector<8x1xf32>
    %36 = arith.divf %34, %35 : vector<8x1xf32>
    %37 = vector.broadcast %29 : vector<8x1xf32> to vector<8x32xf32>
    %38 = arith.subf %1, %37 : vector<8x32xf32>
    %cst_21 = arith.constant 9.99999974E-6 : f32
    %39 = vector.broadcast %cst_21 : f32 to vector<8x1xf32>
    %40 = arith.addf %36, %39 : vector<8x1xf32>
    %41 = math.rsqrt %40 : vector<8x1xf32>
    %42 = vector.broadcast %41 : vector<8x1xf32> to vector<8x32xf32>
    %43 = arith.mulf %38, %42 : vector<8x32xf32>
    %44 = vector.shape_cast %7 : vector<32xf32> to vector<1x32xf32>
    %45 = vector.broadcast %44 : vector<1x32xf32> to vector<8x32xf32>
    %46 = arith.mulf %43, %45 : vector<8x32xf32>
    %47 = vector.shape_cast %9 : vector<32xf32> to vector<1x32xf32>
    %48 = vector.broadcast %47 : vector<1x32xf32> to vector<8x32xf32>
    %49 = arith.addf %46, %48 : vector<8x32xf32>
    %cst_22 = arith.constant dense<0.000000e+00> : vector<16xf32>
    %50 = vector.multi_reduction <add>, %4, %cst_22 [1] : vector<16x32xf32> to vector<16xf32>
    %51 = vector.shape_cast %50 : vector<16xf32> to vector<16x1xf32>
    %cst_23 = arith.constant 3.200000e+01 : f32
    %52 = vector.broadcast %cst_23 : f32 to vector<16x1xf32>
    %53 = arith.divf %51, %52 : vector<16x1xf32>
    %54 = vector.broadcast %53 : vector<16x1xf32> to vector<16x32xf32>
    %55 = arith.subf %4, %54 : vector<16x32xf32>
    %56 = arith.mulf %55, %55 : vector<16x32xf32>
    %cst_24 = arith.constant dense<0.000000e+00> : vector<16xf32>
    %57 = vector.multi_reduction <add>, %56, %cst_24 [1] : vector<16x32xf32> to vector<16xf32>
    %58 = vector.shape_cast %57 : vector<16xf32> to vector<16x1xf32>
    %cst_25 = arith.constant 3.200000e+01 : f32
    %59 = vector.broadcast %cst_25 : f32 to vector<16x1xf32>
    %60 = arith.divf %58, %59 : vector<16x1xf32>
    %61 = vector.broadcast %53 : vector<16x1xf32> to vector<16x32xf32>
    %62 = arith.subf %4, %61 : vector<16x32xf32>
    %cst_26 = arith.constant 9.99999974E-6 : f32
    %63 = vector.broadcast %cst_26 : f32 to vector<16x1xf32>
    %64 = arith.addf %60, %63 : vector<16x1xf32>
    %65 = math.rsqrt %64 : vector<16x1xf32>
    %66 = vector.broadcast %65 : vector<16x1xf32> to vector<16x32xf32>
    %67 = arith.mulf %62, %66 : vector<16x32xf32>
    %68 = vector.shape_cast %7 : vector<32xf32> to vector<1x32xf32>
    %69 = vector.broadcast %68 : vector<1x32xf32> to vector<16x32xf32>
    %70 = arith.mulf %67, %69 : vector<16x32xf32>
    %71 = vector.shape_cast %9 : vector<32xf32> to vector<1x32xf32>
    %72 = vector.broadcast %71 : vector<1x32xf32> to vector<16x32xf32>
    %73 = arith.addf %70, %72 : vector<16x32xf32>
    %74 = arith.truncf %73 : vector<16x32xf32> to vector<16x32xbf16>
    %75 = arith.truncf %49 : vector<8x32xf32> to vector<8x32xbf16>
    %c0_27 = arith.constant 0 : index
    %c0_28 = arith.constant 0 : index
    %c0_29 = arith.constant 0 : index
    %76 = vector.load %arg3[%c0_27, %c0_28, %c0_29] : memref<4x32x32xbf16, #tpu.memory_space<vmem>>, vector<1x32x32xbf16>
    %77 = vector.shape_cast %76 : vector<1x32x32xbf16> to vector<32x32xbf16>
    %cst_30 = arith.constant dense<0.000000e+00> : vector<8x32xf32>
    %78 = tpu.matmul %75, %77, %cst_30 {dimension_numbers = #tpu.dot_dimension_numbers<[1], [0], [0], [1], [0, 0, 1, 1], [], []>} : vector<8x32xbf16>, vector<32x32xbf16>, vector<8x32xf32> -> vector<8x32xf32>
    %79 = vector.shape_cast %11 : vector<32xf32> to vector<1x32xf32>
    %80 = vector.broadcast %79 : vector<1x32xf32> to vector<8x32xf32>
    %81 = arith.addf %78, %80 : vector<8x32xf32>
    %c0_31 = arith.constant 0 : index
    %c0_32 = arith.constant 0 : index
    %82 = vector.load %arg4[%c0_31, %c0_32] : memref<32x64xbf16, #tpu.memory_space<vmem>>, vector<32x64xbf16>
    %cst_33 = arith.constant dense<0.000000e+00> : vector<16x64xf32>
    %83 = tpu.matmul %74, %82, %cst_33 {dimension_numbers = #tpu.dot_dimension_numbers<[1], [0], [0], [1], [0, 0, 1, 1], [], []>} : vector<16x32xbf16>, vector<32x64xbf16>, vector<16x64xf32> -> vector<16x64xf32>
    %84 = vector.extract_strided_slice %83 {offsets = [0, 0], sizes = [16, 32], strides = [1, 1]} : vector<16x64xf32> to vector<16x32xf32>
    %85 = vector.shape_cast %13 : vector<32xf32> to vector<1x32xf32>
    %86 = vector.broadcast %85 : vector<1x32xf32> to vector<16x32xf32>
    %87 = arith.addf %84, %86 : vector<16x32xf32>
    %88 = vector.extract_strided_slice %83 {offsets = [0, 32], sizes = [16, 32], strides = [1, 1]} : vector<16x64xf32> to vector<16x32xf32>
    %89 = vector.shape_cast %15 : vector<32xf32> to vector<1x32xf32>
    %90 = vector.broadcast %89 : vector<1x32xf32> to vector<16x32xf32>
    %91 = arith.addf %88, %90 : vector<16x32xf32>
    %92 = vector.shape_cast %81 : vector<8x32xf32> to vector<1x8x32xf32>
    %93 = vector.shape_cast %92 : vector<1x8x32xf32> to vector<1x8x32xf32>
    %94 = vector.broadcast %93 : vector<1x8x32xf32> to vector<4x8x32xf32>
    %95 = vector.shape_cast %94 : vector<4x8x32xf32> to vector<32x32xf32>
    %96 = arith.truncf %95 : vector<32x32xf32> to vector<32x32xbf16>
    %97 = arith.mulf %96, %5 : vector<32x32xbf16>
    %98 = vector.shape_cast %97 : vector<32x32xbf16> to vector<1x32x32xbf16>
    %99 = arith.truncf %87 : vector<16x32xf32> to vector<16x32xbf16>
    %100 = vector.shape_cast %99 : vector<16x32xbf16> to vector<1x16x32xbf16>
    %101 = arith.truncf %91 : vector<16x32xf32> to vector<16x32xbf16>
    %102 = vector.shape_cast %101 : vector<16x32xbf16> to vector<1x16x32xbf16>
    "tpu.trace_start"() <{level = 10 : i32, message = "gqd,gkd->gqk"}> : () -> ()
    %cst_34 = arith.constant dense<0.000000e+00> : vector<1x32x16xf32>
    %103 = tpu.matmul %98, %100, %cst_34 {dimension_numbers = #tpu.dot_dimension_numbers<[2], [2], [1], [1], [0, 0, 0, 1, 1, 1], [0], [0]>} : vector<1x32x32xbf16>, vector<1x16x32xbf16>, vector<1x32x16xf32> -> vector<1x32x16xf32>
    "tpu.trace_stop"() : () -> ()
    %cst_35 = arith.constant dense<0xFF800000> : vector<1x32xf32>
    %104 = vector.multi_reduction <maximumf>, %103, %cst_35 [2] : vector<1x32x16xf32> to vector<1x32xf32>
    %105 = vector.shape_cast %104 : vector<1x32xf32> to vector<1x32x1xf32>
    %106 = vector.broadcast %105 : vector<1x32x1xf32> to vector<1x32x16xf32>
    %107 = arith.subf %103, %106 : vector<1x32x16xf32>
    %108 = math.exp %107 : vector<1x32x16xf32>
    %cst_36 = arith.constant dense<0.000000e+00> : vector<1x32xf32>
    %109 = vector.multi_reduction <add>, %108, %cst_36 [2] : vector<1x32x16xf32> to vector<1x32xf32>
    %110 = vector.shape_cast %109 : vector<1x32xf32> to vector<1x32x1xf32>
    %111 = tpu.reciprocal %110 {approx = true} : vector<1x32x1xf32> -> vector<1x32x1xf32>
    %112 = vector.broadcast %111 : vector<1x32x1xf32> to vector<1x32x16xf32>
    %113 = arith.mulf %108, %112 : vector<1x32x16xf32>
    %114 = arith.truncf %113 : vector<1x32x16xf32> to vector<1x32x16xbf16>
    "tpu.trace_start"() <{level = 10 : i32, message = "gqk,gkd->gqd"}> : () -> ()
    %cst_37 = arith.constant dense<0.000000e+00> : vector<1x32x32xf32>
    %115 = tpu.matmul %114, %102, %cst_37 {dimension_numbers = #tpu.dot_dimension_numbers<[2], [1], [1], [2], [0, 0, 0, 1, 1, 2], [0], [0]>} : vector<1x32x16xbf16>, vector<1x16x32xbf16>, vector<1x32x32xf32> -> vector<1x32x32xf32>
    "tpu.trace_stop"() : () -> ()
    %116 = arith.extf %5 : vector<32x32xbf16> to vector<32x32xf32>
    %117 = vector.shape_cast %116 : vector<32x32xf32> to vector<1x32x32xf32>
    %118 = arith.mulf %115, %117 : vector<1x32x32xf32>
    %119 = vector.shape_cast %118 : vector<1x32x32xf32> to vector<1x4x8x32xf32>
    %cst_38 = arith.constant dense<0.000000e+00> : vector<1x8x32xf32>
    %120 = vector.multi_reduction <add>, %119, %cst_38 [1] : vector<1x4x8x32xf32> to vector<1x8x32xf32>
    %121 = vector.shape_cast %120 : vector<1x8x32xf32> to vector<8x32xf32>
    %122 = arith.truncf %121 : vector<8x32xf32> to vector<8x32xbf16>
    %c1_39 = arith.constant 1 : index
    %c0_40 = arith.constant 0 : index
    %c0_41 = arith.constant 0 : index
    %123 = vector.load %arg3[%c1_39, %c0_40, %c0_41] : memref<4x32x32xbf16, #tpu.memory_space<vmem>>, vector<1x32x32xbf16>
    %124 = vector.shape_cast %123 : vector<1x32x32xbf16> to vector<32x32xbf16>
    %cst_42 = arith.constant dense<0.000000e+00> : vector<8x32xf32>
    %125 = tpu.matmul %122, %124, %cst_42 {dimension_numbers = #tpu.dot_dimension_numbers<[1], [0], [0], [1], [0, 0, 1, 1], [], []>} : vector<8x32xbf16>, vector<32x32xbf16>, vector<8x32xf32> -> vector<8x32xf32>
    %126 = vector.shape_cast %17 : vector<32xf32> to vector<1x32xf32>
    %127 = vector.broadcast %126 : vector<1x32xf32> to vector<8x32xf32>
    %128 = arith.addf %125, %127 : vector<8x32xf32>
    %129 = vector.shape_cast %1 : vector<8x32xf32> to vector<1x8x32xf32>
    %130 = vector.shape_cast %129 : vector<1x8x32xf32> to vector<8x32xf32>
    %131 = arith.addf %130, %128 : vector<8x32xf32>
    %cst_43 = arith.constant dense<0.000000e+00> : vector<8xf32>
    %132 = vector.multi_reduction <add>, %131, %cst_43 [1] : vector<8x32xf32> to vector<8xf32>
    %133 = vector.shape_cast %132 : vector<8xf32> to vector<8x1xf32>
    %cst_44 = arith.constant 3.200000e+01 : f32
    %134 = vector.broadcast %cst_44 : f32 to vector<8x1xf32>
    %135 = arith.divf %133, %134 : vector<8x1xf32>
    %136 = vector.broadcast %135 : vector<8x1xf32> to vector<8x32xf32>
    %137 = arith.subf %131, %136 : vector<8x32xf32>
    %138 = arith.mulf %137, %137 : vector<8x32xf32>
    %cst_45 = arith.constant dense<0.000000e+00> : vector<8xf32>
    %139 = vector.multi_reduction <add>, %138, %cst_45 [1] : vector<8x32xf32> to vector<8xf32>
    %140 = vector.shape_cast %139 : vector<8xf32> to vector<8x1xf32>
    %cst_46 = arith.constant 3.200000e+01 : f32
    %141 = vector.broadcast %cst_46 : f32 to vector<8x1xf32>
    %142 = arith.divf %140, %141 : vector<8x1xf32>
    %143 = vector.broadcast %135 : vector<8x1xf32> to vector<8x32xf32>
    %144 = arith.subf %131, %143 : vector<8x32xf32>
    %cst_47 = arith.constant 9.99999974E-6 : f32
    %145 = vector.broadcast %cst_47 : f32 to vector<8x1xf32>
    %146 = arith.addf %142, %145 : vector<8x1xf32>
    %147 = math.rsqrt %146 : vector<8x1xf32>
    %148 = vector.broadcast %147 : vector<8x1xf32> to vector<8x32xf32>
    %149 = arith.mulf %144, %148 : vector<8x32xf32>
    %150 = vector.shape_cast %19 : vector<32xf32> to vector<1x32xf32>
    %151 = vector.broadcast %150 : vector<1x32xf32> to vector<8x32xf32>
    %152 = arith.mulf %149, %151 : vector<8x32xf32>
    %153 = vector.shape_cast %21 : vector<32xf32> to vector<1x32xf32>
    %154 = vector.broadcast %153 : vector<1x32xf32> to vector<8x32xf32>
    %155 = arith.addf %152, %154 : vector<8x32xf32>
    %156 = arith.truncf %155 : vector<8x32xf32> to vector<8x32xbf16>
    %c2_48 = arith.constant 2 : index
    %c0_49 = arith.constant 0 : index
    %c0_50 = arith.constant 0 : index
    %157 = vector.load %arg3[%c2_48, %c0_49, %c0_50] : memref<4x32x32xbf16, #tpu.memory_space<vmem>>, vector<1x32x32xbf16>
    %158 = vector.shape_cast %157 : vector<1x32x32xbf16> to vector<32x32xbf16>
    %cst_51 = arith.constant dense<0.000000e+00> : vector<8x32xf32>
    %159 = tpu.matmul %156, %158, %cst_51 {dimension_numbers = #tpu.dot_dimension_numbers<[1], [0], [0], [1], [0, 0, 1, 1], [], []>} : vector<8x32xbf16>, vector<32x32xbf16>, vector<8x32xf32> -> vector<8x32xf32>
    %160 = vector.shape_cast %23 : vector<32xf32> to vector<1x32xf32>
    %161 = vector.broadcast %160 : vector<1x32xf32> to vector<8x32xf32>
    %162 = arith.addf %159, %161 : vector<8x32xf32>
    %cst_52 = arith.constant 0.000000e+00 : f32
    %163 = vector.broadcast %cst_52 : f32 to vector<8x32xf32>
    %164 = arith.maximumf %162, %163 : vector<8x32xf32>
    %165 = arith.truncf %164 : vector<8x32xf32> to vector<8x32xbf16>
    %c3_53 = arith.constant 3 : index
    %c0_54 = arith.constant 0 : index
    %c0_55 = arith.constant 0 : index
    %166 = vector.load %arg3[%c3_53, %c0_54, %c0_55] : memref<4x32x32xbf16, #tpu.memory_space<vmem>>, vector<1x32x32xbf16>
    %167 = vector.shape_cast %166 : vector<1x32x32xbf16> to vector<32x32xbf16>
    %cst_56 = arith.constant dense<0.000000e+00> : vector<8x32xf32>
    %168 = tpu.matmul %165, %167, %cst_56 {dimension_numbers = #tpu.dot_dimension_numbers<[1], [0], [0], [1], [0, 0, 1, 1], [], []>} : vector<8x32xbf16>, vector<32x32xbf16>, vector<8x32xf32> -> vector<8x32xf32>
    %169 = vector.shape_cast %25 : vector<32xf32> to vector<1x32xf32>
    %170 = vector.broadcast %169 : vector<1x32xf32> to vector<8x32xf32>
    %171 = arith.addf %168, %170 : vector<8x32xf32>
    %172 = arith.addf %131, %171 : vector<8x32xf32>
    %173 = vector.shape_cast %172 : vector<8x32xf32> to vector<1x8x32xf32>
    %c0_57 = arith.constant 0 : index
    %c0_58 = arith.constant 0 : index
    %c0_59 = arith.constant 0 : index
    %174 = vector.load %arg7[%c0_57, %c0_58, %c0_59] : memref<1x8x32xf32, #tpu.memory_space<vmem>>, vector<1x8x32xf32>
    tpu.vector_store %arg7[%c0_57, %c0_58, %c0_59], %173 {strides = array<i32>} : memref<1x8x32xf32, #tpu.memory_space<vmem>>, vector<1x8x32xf32>,
    return
  }
  func.func @transform_0(%arg0: i32) -> (i32, i32, i32) {
    %c0_i32 = arith.constant 0 : i32
    %c0_i32_0 = arith.constant 0 : i32
    %c0_i32_1 = arith.constant 0 : i32
    %c0_i32_2 = arith.constant 0 : i32
    return %c0_i32, %c0_i32_0, %c0_i32_1 : i32, i32, i32
  }
  func.func @transform_1(%arg0: i32) -> (i32, i32, i32) {
    %c0_i32 = arith.constant 0 : i32
    %c0_i32_0 = arith.constant 0 : i32
    %c0_i32_1 = arith.constant 0 : i32
    return %arg0, %c0_i32, %c0_i32_0 : i32, i32, i32
  }
  func.func @transform_2(%arg0: i32) -> (i32, i32, i32) {
    %c0_i32 = arith.constant 0 : i32
    %c0_i32_0 = arith.constant 0 : i32
    %c0_i32_1 = arith.constant 0 : i32
    %c0_i32_2 = arith.constant 0 : i32
    return %c0_i32, %c0_i32_0, %c0_i32_1 : i32, i32, i32
  }
  func.func @transform_3(%arg0: i32) -> (i32, i32) {
    %c0_i32 = arith.constant 0 : i32
    %c0_i32_0 = arith.constant 0 : i32
    %c0_i32_1 = arith.constant 0 : i32
    return %c0_i32, %c0_i32_0 : i32, i32
  }
  func.func @transform_4(%arg0: i32) -> (i32, i32) {
    %c0_i32 = arith.constant 0 : i32
    %c0_i32_0 = arith.constant 0 : i32
    %c0_i32_1 = arith.constant 0 : i32
    return %c0_i32, %c0_i32_0 : i32, i32
  }
  func.func @transform_5(%arg0: i32) -> (i32, i32) {
    %c0_i32 = arith.constant 0 : i32
    %c0_i32_0 = arith.constant 0 : i32
    %c0_i32_1 = arith.constant 0 : i32
    return %c0_i32, %c0_i32_0 : i32, i32
  }
  func.func @transform_6(%arg0: i32) -> (i32, i32, i32) {
    %c0_i32 = arith.constant 0 : i32
    %c0_i32_0 = arith.constant 0 : i32
    %c0_i32_1 = arith.constant 0 : i32
    return %arg0, %c0_i32, %c0_i32_0 : i32, i32, i32
  }
}

</mosaic_0001>

<bundles_post_ra>
// kernel: tpu_custom_call.1
= control target key start
LH: loop header
LB: loop body
LE: loop exit
PB: predicated region body
PF: predicated region fallthrough
CT: control target
= control target key end

     0   :  { %11 = vsyncpa [#allocation3], 0  ;;  %s1985_s0 = inlined_call_operand.hbm [shape: f32[1,8,32], index: 0, kind: input, shape index: {}]   ;;  %s1986_s1 = inlined_call_operand.hbm [shape: bf16[2,16,32], index: 1, kind: input, shape index: {}]   ;;  %s1987_s2 = inlined_call_operand.hbm [shape: bf16[4,32,32], index: 2, kind: input, shape index: {}]   ;;  %s1988_s3 = inlined_call_operand.hbm [shape: bf16[32,64], index: 3, kind: input, shape index: {}]   ;;  %s1989_s4 = inlined_call_operand.hbm [shape: f32[10,32], index: 4, kind: input, shape index: {}]   ;;  %s1990_s5 = inlined_call_operand.vmem [shape: bf16[32,32], index: 5, kind: input, shape index: {}]   ;;  %s1991_s6 = inlined_call_operand.hbm [shape: f32[2,8,32], index: 6, kind: output, shape index: {}]  }
   0x1   :  { %12 = vsyncpa [#allocation6], 0 }
   0x2   :  { %14 = vsyncpa [#allocation6 + $0x1], 0 }
   0x3   :  { %15 = vsyncpa [#allocation9], 0 }
   0x4   :  { %16 = vsyncpa [#allocation4], 0 }
   0x5   :  { %18 = vsyncpa [#allocation4 + $0x1], 0  ;;  %s1619_s21 = smov 0   ;;  %s1621_s22 = smov 0  }
   0x6   :  { %s1623_s23 = smov 0   ;;  %s1625_s24 = smov 0  }
   0x7 LB: > { %s1640_s25 = sadd.s32 4294967295, %s1568_s24   ;;  %s1084_s26 = sadd.s32 4294967294, %s1568_s24   ;;  %s1568_s24 = sphi %s1625_s24, %s2016_s24   ;;  %s1564_s23 = sphi %s1623_s23, %s2015_s23   ;;  %s1560_s22 = sphi %s1621_s22, %s2014_s22   ;;  %s1556_s21 = sphi %s1619_s21, %s2013_s21  }
   0x8   : > { %p65_p0 = scmp.ne.s32.totalorder %s1560_s22, %s1556_s21  ;;  %p1992_p1 = scmp.eq.s32.totalorder %s1640_s25, 0 }
   0x9   : > { %p179_p3 = scmp.eq.s32.totalorder %s1084_s26, 1  ;;  %p1085_p5 = scmp.ge.s32.totalorder %s1568_s24, 1 }
   0xa   : > { %p1649_p4 = por %p1992_p1, %p65_p0  ;;  %p186_p7 = scmp.lt.s32.totalorder %s1568_s24, 3 }
   0xb   : > { %p1654_p6 = por %p179_p3, %p65_p0  ;;  %s1570_s30 = smov [#allocation7]  }
   0xc   : > { %s1995_s27 = scalar_select %p1649_p4, 1, 0 }
   0xd   : > { %s1996_s28 = scalar_select %p1654_p6, 1, 0 }
   0xe   : > { %p1659_p8 = pnand %p1085_p5, %p186_p7  ;;  %s209_s7 = sshll.u32 %s1570_s30, 4  ;;  %s1663_s7 = int_to_ptr.vmem [resolvable:$true] %s209_s7 }
   0xf   : > { %s1571_s9 = smov [#allocation8]   ;;  %s1572_s11 = smov [#allocation2]  }
  0x10   : > { %s1997_s29 = scalar_select %p1659_p8, 1, 0 }
  0x11   : > { %p1235_p9 = pneg %p1659_p8  ;;  %s222_s10 = sshll.u32 %s1571_s9, 4  ;;  %s1674_s10 = int_to_ptr.vmem [resolvable:$true] %s222_s10 }
  0x12   : > { %s1676_s12 = sshll.u32 %s1572_s11, 4  ;;  %s1348_s15 = scalar_lea.hbm %s1987_s2, 1024  ;;  %s200_s12 = int_to_ptr.vmem [resolvable:$true] %s1676_s12 }
  0x13   : > { %p1670_p11 = pnand %p1235_p9, %p1992_p1  ;;  %p1349_p12 = scmp.ne.s32.totalorder %s1987_s2, %s1348_s15 }
  0x14   : > { %p1355_p5 = scmp.lt.u32.totalorder %s1348_s15, %s1987_s2 }
  0x15   : > { %p1686_p13 = pneg %p1670_p11 }
  0x17   : > { %p1351_p0 = pnand %p1686_p13, %p1349_p12 }
  0x19   : > { %p1352_p3 = pneg %p1351_p0 }
  0x1b   : > { %p1357_p7 = pnand %p1355_p5, %p1352_p3 }
  0x1d   : > { %1360 = shalt.err (!%p1357_p7)
}
  0x1e   : > { %s1361_s26 = scalar_lea.vmem %s1663_s7, 1024  ;;  %p1369_p2 = scmp.lt.s32.totalorder %s1663_s7, %s1663_s7 }
  0x1f   : > { %p1362_p9 = scmp.ne.s32.totalorder %s1663_s7, %s1361_s26  ;;  %p1370_p6 = scmp.lt.s32.totalorder %s1361_s26, %s1361_s26 }
  0x21   : > { %p1364_p10 = pnand %p1362_p9, %p1686_p13  ;;  %p1371_p12 = por %p1370_p6, %p1369_p2 }
  0x23   : > { %p1365_p1 = pneg %p1364_p10 }
  0x25   : > { %p1372_p0 = pnand %p1371_p12, %p1365_p1 }
  0x27   : > { %1375 = shalt.err (!%p1372_p0)
}
  0x28   : > { %s1573_s30 = smov 64   ;;  %s1574_s9 = smov 4  }
  0x29   : > { %1241 = dma.hbm_to_vmem [thread:$0]  (!%p1670_p11), %s1987_s2, 1024, %s1663_s7, [#allocation6], %s1573_s30, %s1573_s30, %s1574_s9  }
  0x2a   : > { %s1376_s16 = scalar_lea.hbm %s1988_s3, 256 }
  0x2b   : > { %p1377_p1 = scmp.ne.s32.totalorder %s1988_s3, %s1376_s16  ;;  %p1383_p10 = scmp.lt.u32.totalorder %s1376_s16, %s1988_s3 }
  0x2d   : > { %p1379_p2 = pnand %p1377_p1, %p1686_p13 }
  0x2f   : > { %p1380_p6 = pneg %p1379_p2 }
  0x31   : > { %p1385_p3 = pnand %p1383_p10, %p1380_p6 }
  0x33   : > { %1388 = shalt.err (!%p1385_p3)
}
  0x34   : > { %s1389_s7 = scalar_lea.vmem %s1674_s10, 256  ;;  %p1397_p12 = scmp.lt.s32.totalorder %s1674_s10, %s1674_s10 }
  0x35   : > { %p1390_p5 = scmp.ne.s32.totalorder %s1674_s10, %s1389_s7  ;;  %p1398_p0 = scmp.lt.s32.totalorder %s1389_s7, %s1389_s7 }
  0x37   : > { %p1392_p7 = pnand %p1390_p5, %p1686_p13  ;;  %p1399_p1 = por %p1398_p0, %p1397_p12 }
  0x39   : > { %p1393_p9 = pneg %p1392_p7 }
  0x3b   : > { %p1400_p2 = pnand %p1399_p1, %p1393_p9 }
  0x3d   : > { %1403 = shalt.err (!%p1400_p2)
}
  0x3e   : > { %1244 = dma.hbm_to_vmem [thread:$0]  (!%p1670_p11), %s1988_s3, 256, %s1674_s10, [#allocation9], %s1573_s30, %s1573_s30, %s1574_s9  }
  0x3f   : > { %s1404_s16 = scalar_lea.hbm %s1985_s0, 128 }
  0x40   : > { %p1405_p6 = scmp.ne.s32.totalorder %s1985_s0, %s1404_s16  ;;  %p1411_p5 = scmp.lt.u32.totalorder %s1404_s16, %s1985_s0 }
  0x42   : > { %p1407_p10 = pnand %p1405_p6, %p1686_p13 }
  0x44   : > { %p1408_p3 = pneg %p1407_p10 }
  0x46   : > { %p1413_p7 = pnand %p1411_p5, %p1408_p3 }
  0x48   : > { %1416 = shalt.err (!%p1413_p7)
}
  0x49   : > { %s1417_s7 = scalar_lea.vmem %s200_s12, 128  ;;  %p1425_p1 = scmp.lt.s32.totalorder %s200_s12, %s200_s12 }
  0x4a   : > { %p1418_p9 = scmp.ne.s32.totalorder %s200_s12, %s1417_s7  ;;  %p1426_p2 = scmp.lt.s32.totalorder %s1417_s7, %s1417_s7 }
  0x4c   : > { %p1420_p12 = pnand %p1418_p9, %p1686_p13  ;;  %p1427_p4 = por %p1426_p2, %p1425_p1 }
  0x4e   : > { %p1421_p0 = pneg %p1420_p12 }
  0x50   : > { %p1428_p8 = pnand %p1427_p4, %p1421_p0 }
  0x52   : > { %1431 = shalt.err (!%p1428_p8)
}
  0x53   : > { %1238 = dma.hbm_to_vmem [thread:$0]  (!%p1670_p11), %s1985_s0, 128, %s200_s12, [#allocation3]  }
  0x54   : > { %s1575_s13 = smov [#allocation10]   ;;  %s1432_s17 = scalar_lea.hbm %s1989_s4, 256 }
  0x55   : > { %s235_s14 = sshll.u32 %s1575_s13, 4  ;;  %p1433_p6 = scmp.ne.s32.totalorder %s1989_s4, %s1432_s17  ;;  %s236_s14 = int_to_ptr.vmem [resolvable:$true] %s235_s14 }
  0x56   : > { %p1439_p10 = scmp.lt.u32.totalorder %s1432_s17, %s1989_s4 }
  0x57   : > { %p1435_p4 = pnand %p1433_p6, %p1686_p13 }
  0x59   : > { %p1436_p8 = pneg %p1435_p4 }
  0x5b   : > { %p1441_p3 = pnand %p1439_p10, %p1436_p8 }
  0x5d   : > { %1444 = shalt.err (!%p1441_p3)
}
  0x5e   : > { %s1445_s12 = scalar_lea.vmem %s236_s14, 256  ;;  %p1453_p12 = scmp.lt.s32.totalorder %s236_s14, %s236_s14 }
  0x5f   : > { %p1446_p5 = scmp.ne.s32.totalorder %s236_s14, %s1445_s12  ;;  %p1454_p0 = scmp.lt.s32.totalorder %s1445_s12, %s1445_s12 }
  0x61   : > { %p1448_p7 = pnand %p1446_p5, %p1686_p13  ;;  %p1455_p1 = por %p1454_p0, %p1453_p12 }
  0x63   : > { %p1449_p9 = pneg %p1448_p7 }
  0x65   : > { %p1456_p2 = pnand %p1455_p1, %p1449_p9 }
  0x67   : > { %1459 = shalt.err (!%p1456_p2)
}
  0x68   : > { %s1576_s10 = smov 128   ;;  %s1577_s18 = smov 8  }
  0x69   : > { %1247 = dma.hbm_to_vmem [thread:$0]  (!%p1670_p11), %s1989_s4, 256, %s236_s14, [#allocation9], %s1576_s10, %s1576_s10, %s1577_s18  }
  0x6a   : > { %s1774_s15 = sadd.s32 1, %s1568_s24   ;;  %s52_s17 = sadd.s32 1, %s1564_s23 }
  0x6b   : > { %s49_s16 = ssub.s32 %s1568_s24, %s1774_s15  ;;  %p59_p6 = scmp.ne.s32.totalorder %s1564_s23, %s1560_s22 }
  0x6c   : > { %p50_p13 = scmp.eq.s32.totalorder %s49_s16, 0  ;;  %p60_p4 = scmp.eq.s32.totalorder %s1568_s24, 0 }
  0x6d   : > { %p2000_p10 = scmp.eq.s32.totalorder %s1640_s25, 1  ;;  %p1260_p5 = scmp.lt.s32.totalorder %s1568_s24, 2 }
  0x6e   : > { %s1783_s19 = scalar_select %p50_p13, %s1564_s23, %s52_s17  }
  0x6f   : > { %p61_p8 = por %p60_p4, %p59_p6  ;;  %p1787_p3 = por %p2000_p10, %p59_p6 }
  0x70   : > { %s252_s8 = sand.u32 1, %s1568_s24   ;;  %s254_s26 = sand.u32 1, %s1564_s23  }
  0x71   : > { %s1091_s14 = sshll.u32 %s254_s26, 3  ;;  %s1136_s7 = sshll.u32 %s1568_s24, 7 }
  0x72   : > { %s1798_s18 = scalar_lea.hbm %s1986_s1, %s1136_s7  ;;  %s256_s11 = scalar_lea.vmem [#allocation5], %s1091_s14 }
  0x73   : > { %s263_s13 = sshll.u32 %s256_s11, 4  ;;  %p1800_p11 = pnand %p1260_p5, %p61_p8  ;;  %s1804_s13 = int_to_ptr.vmem [resolvable:$true] %s263_s13 }
  0x74   : > { %s1806_s17 = scalar_lea.sflag [#allocation6], %s252_s8  ;;  %s1460_s26 = scalar_lea.hbm %s1798_s18, 128 }
  0x75   : > { %p1461_p7 = scmp.ne.s32.totalorder %s1798_s18, %s1460_s26  ;;  %p1462_p9 = pneg %p1800_p11 }
  0x76   : > { %s1465_s12 = scalar_lea.hbm %s1986_s1, 256  ;;  %p1466_p1 = scmp.lt.u32.totalorder %s1798_s18, %s1986_s1 }
  0x77   : > { %p1463_p12 = pnand %p1462_p9, %p1461_p7  ;;  %p1467_p2 = scmp.lt.u32.totalorder %s1465_s12, %s1460_s26 }
  0x78   : > { %p1469_p6 = scmp.lt.u32.totalorder %s1460_s26, %s1798_s18 }
  0x79   : > { %p1464_p0 = pneg %p1463_p12  ;;  %p1468_p13 = por %p1467_p2, %p1466_p1 }
  0x7b   : > { %p1470_p4 = por %p1469_p6, %p1468_p13 }
  0x7d   : > { %p1471_p8 = pnand %p1470_p4, %p1464_p0 }
  0x7f   : > { %1474 = shalt.err (!%p1471_p8)
}
  0x80   : > { %s1475_s8 = scalar_lea.vmem %s1804_s13, 128  ;;  %s1578_s14 = smov [#allocation5]  }
  0x81   : > { %p1476_p10 = scmp.ne.s32.totalorder %s1804_s13, %s1475_s8  ;;  %s1480_s7 = sshll.u32 %s1578_s14, 4  ;;  %s1481_s7 = int_to_ptr.vmem [resolvable:$false] %s1480_s7 }
  0x82   : > { %s1482_s10 = scalar_lea.vmem %s1481_s7, 256  ;;  %p1483_p12 = scmp.lt.s32.totalorder %s1804_s13, %s1481_s7 }
  0x83   : > { %p1478_p5 = pnand %p1476_p10, %p1462_p9  ;;  %p1484_p1 = scmp.lt.s32.totalorder %s1482_s10, %s1475_s8 }
  0x85   : > { %p1479_p7 = pneg %p1478_p5  ;;  %p1485_p2 = por %p1484_p1, %p1483_p12 }
  0x87   : > { %p1486_p13 = pnand %p1485_p2, %p1479_p7 }
  0x89   : > { %1489 = shalt.err (!%p1486_p13)
}
  0x8a   : > { %1251 = dma.hbm_to_vmem [thread:$0]  (!%p1800_p11), %s1798_s18, 128, %s1804_s13, %s1806_s17, %s1573_s30, %s1573_s30, %s1574_s9  }
  0x8b   : > { %p2003_p9 = scmp.ne.s32.totalorder %s1997_s29, 0 }
  0x8c   : > { %p2004_p0 = scmp.eq.s32.totalorder (!%p2003_p9), %s1640_s25, 0 }
  0x8d   : > { %275 = sbr.rel (%p2003_p9) target bundleno = 2459 (0x99b), region = 44 }
  0x94   : > { %1535 = dma.done.wait (%p2004_p0), [#allocation3], 128   ;;  %p2005_p6 = pmov %p2004_p0 }
  0x95   : > { %s281_s16 = sand.u32 1, %s1640_s25   ;;  %s283_s26 = sand.u32 1, %s1560_s22  }
  0x96   : > { %1537 = vsyncadd (%p2005_p6), [#allocation3], 4294967168  ;;  %s1847_s12 = sshll.u32 %s283_s26, 3  ;;  %s282_s30 = scalar_lea.sflag [#allocation6], %s281_s16 }
  0x97   : > { %s285_s9 = scalar_lea.vmem [#allocation5], %s1847_s12  ;;  %p2006_p11 = scmp.ne.s32.totalorder %s1995_s27, 0 }
  0x99   : > { %1539 = dma.done.wait (%p2006_p11), %s282_s30, 128  }
  0x9a   : > { %1541 = vsyncadd (%p2006_p11), %s282_s30, 4294967168  ;;  %p2007_p4 = pmov %p2004_p0 }
  0x9b   : > { %p2008_p8 = pmov %p2004_p0 }
  0x9c   : > { %1543 = dma.done.wait (%p2007_p4), [#allocation6], 1024  }
  0x9d   : > { %1545 = vsyncadd (%p2008_p8), [#allocation6], 4294966272  ;;  %p2009_p10 = pmov %p2004_p0 }
  0x9e   : > { %p2010_p5 = pmov %p2004_p0 }
  0x9f   : > { %1547 = dma.done.wait (%p2009_p10), [#allocation9], 512  }
  0xa0   : > { %1549 = vsyncadd (%p2010_p5), [#allocation9], 4294966784  ;;  %v1138_v0 = vld [vmem:[%s285_s9] sm:$0xff]   ;;  %vm346_vm0 = vcmask 261120   ;;  %v1862_v1 = vld [vmem:[#allocation2] sm:$0xff]  ;;  %v1579_v24 = vmov 0.0  }
  0xa1   : > { %v1139_v2 = vunpack.c.l.bf16 %v1138_v0  ;;  %v1140_v3 = vunpack.c.h.bf16 %v1138_v0  ;;  %v347_v4 = vsel %vm346_vm0, %v1862_v1, 0.0  ;;  %v1310_v22 = vld [vmem:[#allocation7] sm:$0xff]   ;;  %1162 = vmatprep.subr.bf16.mxu0 %v1579_v24  ;;  %1170 = vmatprep.subr.bf16.mxu1 %v1579_v24  ;;  %v1312_v25 = vld [vmem:[#allocation7 + $0x8] sm:$0xff]   ;;  %vm1580_vm1 = vmmov 0   ;;  %v1101_v38 = vld [vmem:[#allocation10] ss:$0 sm:$0xff] }
  0xa2   : > { %348 = vadd.xlane.f32.xlu1 %v347_v4  ;;  %v1311_v23 = vld [vmem:[#allocation8] sm:$0xff]   ;;  %1163 = vmatpush3.bf16.msra.mxu0 %v1310_v22  ;;  %v1313_v26 = vld [vmem:[#allocation8 + $0x8] sm:$0xff]   ;;  %v1102_v43 = vld [vmem:[#allocation10 + $0x1] ss:$0 sm:$0xff]  ;;  %vm617_vm2 = vcmask 130048   ;;  %s1581_s17 = smov 32  }
  0xa3   : > { %v371_v5 = vsel %vm346_vm0, %v1139_v2, 0.0  ;;  %v374_v6 = vsel %vm346_vm0, %v1140_v3, 0.0  ;;  %1171 = vmatpush3.bf16.msra.mxu1 %v1311_v23  ;;  %1164 = vmatprep.subr.bf16.mxu0 %v1579_v24  ;;  %v1885_v52 = vld [vmem:[%s1990_s5] sm:$0xff]   ;;  %v1103_v53 = vld [vmem:[#allocation10 + $0x2] ss:$0 sm:$0xff]  ;;  %s1582_s11 = smov 96  }
  0xa4   : > { %372 = vadd.xlane.f32.xlu0 %v371_v5  ;;  %1172 = vmatprep.subr.bf16.mxu1 %v1579_v24  ;;  %v1110_v54 = vld [vmem:[#allocation10 + $0x3] ss:$0 sm:$0xff]  ;;  %v1890_v5 = vld [vmem:[%s1990_s5 + $0x8] sm:$0xff]   ;;  %s1133_s8 = sshll.u32 %s1640_s25, 7  ;;  %s325_s14 = scalar_lea.vmem [#allocation11], %s1847_s12 }
  0xa5   : > { %1166 = vmatprep.mubr.msk.bf16.mxu0 %vm1580_vm1, %v1579_v24  ;;  %1174 = vmatprep.mubr.msk.bf16.mxu1 %vm1580_vm1, %v1579_v24  ;;  %s974_s7 = sshll.u32 %s325_s14, 4  ;;  %s1939_s30 = scalar_lea.hbm %s1991_s6, %s1133_s8  ;;  %s1941_s7 = int_to_ptr.vmem [resolvable:$true] %s974_s7 }
  0xa6   : > { %1165 = vmatpush3.bf16.msra.mxu0 %v1312_v25  ;;  %s961_s25 = scalar_lea.sflag [#allocation4], %s283_s26  ;;  %s1490_s12 = scalar_lea.vmem %s1941_s7, 128 }
  0xa7   : > { %1173 = vmatpush3.bf16.msra.mxu1 %v1313_v26  ;;  %p1491_p7 = scmp.ne.s32.totalorder %s1941_s7, %s1490_s12  ;;  %s1583_s9 = smov [#allocation11]  }
  0xa8   : > { %375 = vadd.xlane.f32.xlu0 %v374_v6  ;;  %s1494_s27 = sshll.u32 %s1583_s9, 4  ;;  %s1495_s27 = int_to_ptr.vmem [resolvable:$false] %s1494_s27 }
  0xa9   : > { %p1492_p12 = pnand %p1491_p7, %p1787_p3  ;;  %s1496_s29 = scalar_lea.vmem %s1495_s27, 256 }
  0xaa   : > { %p1497_p2 = scmp.lt.s32.totalorder %s1941_s7, %s1495_s27  ;;  %p1498_p13 = scmp.lt.s32.totalorder %s1496_s29, %s1490_s12 }
  0xab   : > { %p1493_p1 = pneg %p1492_p12 }
  0xac   : > { %p1499_p9 = por %p1498_p13, %p1497_p2 }
  0xae   : > { %p1500_p0 = pnand %p1499_p9, %p1493_p1 }
 0x12f   : > { %v349_v7 = vpop.xlane.xlu1 %348 }
 0x130   : > { %v351_v8 = vmul.f32 0.03125, %v349_v7 }
 0x131   : > { %v373_v9 = vpop.xlane.xlu0 %372 }
 0x132   : > { %v377_v10 = vmul.f32 0.03125, %v373_v9  ;;  %v352_v11 = vsub.f32 %v1862_v1, %v351_v8 }
 0x134   : > { %v379_v12 = vsub.f32 %v1139_v2, %v377_v10  ;;  %v353_v16 = vmul.f32 %v352_v11, %v352_v11 }
 0x135   : > { %v376_v13 = vpop.xlane.xlu0 %375 }
 0x136   : > { %v378_v14 = vmul.f32 0.03125, %v376_v13  ;;  %v381_v15 = vmul.f32 %v379_v12, %v379_v12  ;;  %v354_v20 = vsel %vm346_vm0, %v353_v16, 0.0 }
 0x138   : > { %v380_v17 = vsub.f32 %v1140_v3, %v378_v14  ;;  %v383_v18 = vsel %vm346_vm0, %v381_v15, 0.0 }
 0x139   : > { %384 = vadd.xlane.f32.xlu1 %v383_v18 }
 0x13a   : > { %v382_v19 = vmul.f32 %v380_v17, %v380_v17 }
 0x13c   : > { %v386_v21 = vsel %vm346_vm0, %v382_v19, 0.0 }
 0x13d   : > { %387 = vadd.xlane.f32.xlu0 %v386_v21  ;;  %355 = vadd.xlane.f32.xlu1 %v354_v20 }
 0x1c6   : > { %v385_v27 = vpop.xlane.xlu1 %384 }
 0x1c7   : > { %v389_v28 = vmul.f32 0.03125, %v385_v27 }
 0x1c9   : > { %v391_v29 = vadd.f32 1e-05, %v389_v28 }
 0x1ca   : > { %v388_v30 = vpop.xlane.xlu0 %387  ;;  %v356_v31 = vpop.xlane.xlu1 %355 }
 0x1cb   : > { %1324 = vrsqrt.f32 %v391_v29  ;;  %v390_v32 = vmul.f32 0.03125, %v388_v30  ;;  %v357_v33 = vmul.f32 0.03125, %v356_v31 }
 0x1cd   : > { %v392_v34 = vadd.f32 1e-05, %v390_v32  ;;  %v358_v35 = vadd.f32 1e-05, %v357_v33 }
 0x1cf   : > { %1326 = vrsqrt.f32 %v392_v34 }
 0x1d0   : > { %1328 = vrsqrt.f32 %v358_v35 }
 0x1d5   : > { %v1325_v36 = vpop.eup %1324 }
 0x1d6   : > { %v395_v37 = vmul.f32 %v1325_v36, %v379_v12 }
 0x1d8   : > { %v397_v42 = vmul.f32 %v1101_v38, %v395_v37 }
 0x1d9   : > { %v1327_v39 = vpop.eup %1326 }
 0x1da   : > { %v1329_v40 = vpop.eup %1328  ;;  %v396_v41 = vmul.f32 %v1327_v39, %v380_v17  ;;  %v399_v47 = vadd.f32 %v1102_v43, %v397_v42  ;;  %v1111_v17 = vld [vmem:[#allocation10 + $0x4] ss:$0 sm:$0xff] }
 0x1db   : > { %v360_v44 = vmul.f32 %v1329_v40, %v352_v11 }
 0x1dc   : > { %v398_v45 = vmul.f32 %v1101_v38, %v396_v41 }
 0x1dd   : > { %v365_v46 = vmul.f32 %v1101_v38, %v360_v44 }
 0x1de   : > { %v400_v48 = vadd.f32 %v1102_v43, %v398_v45 }
 0x1df   : > { %v370_v49 = vadd.f32 %v1102_v43, %v365_v46 }
 0x1e0   : > { %v401_v50 = vpack.c.bf16 %v400_v48, %v399_v47 }
 0x1e1   : > { %v402_v51 = vpack.c.bf16 %v370_v49, %v370_v49 }
 0x1e2   : > { %1175 = vmatmul.mubr.msk.bf16.vlgmr.msra.gmra.mrb[0].mxu1 %vm346_vm0, %v401_v50 }
 0x1e3   : > { %1167 = vmatmul.mubr.msk.bf16.vlgmr.msra.gmra.mrb[0].mxu0 %vm346_vm0, %v402_v51 }
 0x2b5   : > { %v519_v55 = vpop.f32.mrb[0].mxu1 }
 0x2b6   : > { %v460_v56 = vpop.f32.mrb[0].mxu0  ;;  %v1176_v57 = vpop.f32.mrb[1].mxu1  ;;  %v530_v61 = vadd.f32 %v1110_v54, %v519_v55 }
 0x2b7   : > { %v461_v58 = vadd.f32 %v1103_v53, %v460_v56  ;;  %v1168_v59 = vpop.f32.mrb[1].mxu0  ;;  %v522_v60 = vpop.f32.mrb[2].mxu1 }
 0x2b8   : > { %v463_v62 = vpop.f32.mrb[2].mxu0  ;;  %v531_v63 = vadd.f32 %v1110_v54, %v522_v60  ;;  %v1177_v0 = vpop.f32.mrb[3].mxu1  ;;  %v1316_v59 = vld [vmem:[#allocation7 + $0x10] sm:$0xff]  }
 0x2b9   : > { %v542_v2 = vpack.c.bf16 %v461_v58, %v461_v58  ;;  %v1169_v3 = vpop.f32.mrb[3].mxu0  ;;  %v724_v0 = vunpack.c.h.bf16 %v1885_v52 }
 0x2ba   : > { %v557_v4 = vpack.c.bf16 %v531_v63, %v530_v61  ;;  %v723_v61 = vunpack.c.l.bf16 %v1885_v52  ;;  %v725_v63 = vunpack.c.l.bf16 %v1890_v5 }
 0x2bb   : > { %v555_v6 = vmul.bf16 %v542_v2, %v1885_v52  ;;  %v556_v8 = vmul.bf16 %v542_v2, %v1890_v5 }
 0x2bc   : > { %1214 = vmatprep.subr.msk.bf16.mxu0 %vm346_vm0, %v557_v4  ;;  %v566_v7 = vsel %vm346_vm0, %v557_v4, 0 }
 0x2bd   : > { %1180 = vmatprep.mubr.msk.bf16.mxu0 %vm346_vm0, %v555_v6  ;;  %1179 = vmatpush3.bf16.xpose.msra.mxu0 %v566_v7  ;;  %v726_v6 = vunpack.c.h.bf16 %v1890_v5  ;;  %v1118_v5 = vld [vmem:[#allocation10 + $0x5] ss:$0 sm:$0xff] }
 0x2be   : > { %1190 = vmatprep.subr.bf16.mxu0 %v1579_v24 }
 0x2c4   : > { %1181 = vmatmul.mubr.msk.bf16.vlgmr.msra.gmra.mrb[4].mxu0 %vm346_vm0, %v556_v8 }
 0x2c5   : > { %1194 = vmatprep.mubr.msk.bf16.mxu0 %vm1580_vm1, %v1579_v24  ;;  %1191 = vmatpush3.bf16.msra.mxu0 %v1316_v59 }
 0x2c6   : > { %1192 = vmatprep.subr.bf16.mxu0 %v1579_v24 }
 0x397   : > { %v1182_v9 = vpop.f32.mrb[4].mxu0 }
 0x398   : > { %v602_v10 = vpop.f32.mrb[5].mxu0  ;;  %v624_v15 = vsel %vm617_vm2, %v1182_v9, -inf }
 0x399   : > { %v1183_v11 = vpop.f32.mrb[6].mxu0  ;;  %v618_v12 = vsel %vm617_vm2, %v602_v10, -inf }
 0x39a   : > { %619 = vmax.xlane.f32.xlu0 %v618_v12  ;;  %v605_v13 = vpop.f32.mrb[7].mxu0  ;;  %v627_v16 = vsel %vm617_vm2, %v1183_v11, -inf }
 0x39b   : > { %v621_v14 = vsel %vm617_vm2, %v605_v13, -inf }
 0x39c   : > { %622 = vmax.xlane.f32.xlu1 %v621_v14 }
 0x39e   : > { %625 = vmax.xlane.f32.xlu0 %v624_v15 }
 0x3a0   : > { %628 = vmax.xlane.f32.xlu1 %v627_v16 }
 0x3b4   : > { %537 = vrot.lane.b32.xlu0 %v1111_v17, %s1581_s17 }
 0x427   : > { %v620_v18 = vpop.xlane.xlu0 %619 }
 0x428   : > { %v630_v20 = vsub.f32 %v602_v10, %v620_v18 }
 0x429   : > { %v623_v19 = vpop.xlane.xlu1 %622 }
 0x42a   : > { %v634_v25 = vmul.f32 1.442695, %v630_v20  ;;  %v631_v31 = vsub.f32 %v605_v13, %v623_v19 }
 0x42b   : > { %v626_v21 = vpop.xlane.xlu0 %625 }
 0x42c   : > { %v632_v22 = vsub.f32 %v1182_v9, %v626_v21  ;;  %v636_v34 = vmul.f32 1.442695, %v631_v31  ;;  %v1318_v31 = vld [vmem:[#allocation7 + $0x20] sm:$0xff]  }
 0x42d   : > { %v629_v23 = vpop.xlane.xlu1 %628 }
 0x42e   : > { %v638_v26 = vmul.f32 1.442695, %v632_v22  ;;  %v633_v27 = vsub.f32 %v1183_v11, %v629_v23 }
 0x42f   : > { %v538_v28 = vpop.permute.xlu0 %537 }
 0x430   : > { %1330 = vpow2.f32 %v638_v26  ;;  %v540_v29 = vadd.f32 %v538_v28, %v519_v55  ;;  %v541_v30 = vadd.f32 %v538_v28, %v522_v60  ;;  %v640_v32 = vmul.f32 1.442695, %v633_v27  ;;  %v1317_v60 = vld [vmem:[#allocation7 + $0x18] sm:$0xff]  }
 0x431   : > { %1332 = vpow2.f32 %v634_v25  ;;  %1193 = vmatpush3.bf16.msra.mxu0 %v1317_v60 }
 0x432   : > { %v558_v33 = vpack.c.bf16 %v541_v30, %v540_v29  ;;  %1334 = vpow2.f32 %v640_v32  ;;  %1206 = vmatprep.subr.bf16.mxu0 %v1579_v24  ;;  %v1319_v32 = vld [vmem:[#allocation7 + $0x28] sm:$0xff]  }
 0x433   : > { %1336 = vpow2.f32 %v636_v34 }
 0x43a   : > { %v1331_v35 = vpop.eup %1330 }
 0x43b   : > { %v648_v36 = vsel %vm617_vm2, %v1331_v35, 0.0  ;;  %v1333_v37 = vpop.eup %1332 }
 0x43c   : > { %649 = vadd.xlane.f32.xlu1 %v648_v36  ;;  %v642_v38 = vsel %vm617_vm2, %v1333_v37, 0.0  ;;  %v1335_v39 = vpop.eup %1334  ;;  %v1122_v36 = vld [vmem:[#allocation10 + $0x6] ss:$0 sm:$0xff] }
 0x43d   : > { %v651_v40 = vsel %vm617_vm2, %v1335_v39, 0.0  ;;  %v1337_v41 = vpop.eup %1336 }
 0x43e   : > { %v645_v42 = vsel %vm617_vm2, %v1337_v41, 0.0 }
 0x440   : > { %643 = vadd.xlane.f32.xlu1 %v642_v38  ;;  %v1123_v38 = vld [vmem:[#allocation10 + $0x7] ss:$0 sm:$0xff] }
 0x444   : > { %652 = vadd.xlane.f32.xlu1 %v651_v40 }
 0x448   : > { %646 = vadd.xlane.f32.xlu1 %v645_v42  ;;  %v1320_v42 = vld [vmem:[#allocation7 + $0x30] sm:$0xff]  }
 0x459   : > { %665 = vrot.lane.b32.xlu1 %v558_v33, %s1582_s11 }
 0x4c9   : > { %v650_v43 = vpop.xlane.xlu1 %649 }
 0x4cd   : > { %v644_v44 = vpop.xlane.xlu1 %643 }
 0x4d1   : > { %v653_v45 = vpop.xlane.xlu1 %652 }
 0x4d2   : > { %1338 = vrcp.f32 %v653_v45 }
 0x4d3   : > { %1340 = vrcp.f32 %v644_v44  ;;  %v1124_v44 = vld [vmem:[#allocation10 + $0x8] ss:$0 sm:$0xff] }
 0x4d4   : > { %1342 = vrcp.f32 %v650_v43  ;;  %v1321_v43 = vld [vmem:[#allocation7 + $0x38] sm:$0xff]  }
 0x4d5   : > { %v647_v46 = vpop.xlane.xlu1 %646 }
 0x4d6   : > { %1344 = vrcp.f32 %v647_v46 }
 0x4d9   : > { %v666_v47 = vpop.permute.xlu1 %665 }
 0x4da   : > { %1184 = vmatprep.subr.bf16.mxu1 %v666_v47 }
 0x4db   : > { %1185 = vmatpush3.bf16.msra.mxu1 %v666_v47 }
 0x4dc   : > { %1198 = vmatprep.subr.bf16.mxu1 %v1579_v24  ;;  %v1339_v48 = vpop.eup %1338 }
 0x4dd   : > { %v1341_v49 = vpop.eup %1340  ;;  %v661_v53 = vmul.f32 %v1339_v48, %v1335_v39 }
 0x4de   : > { %v1343_v50 = vpop.eup %1342  ;;  %v658_v54 = vmul.f32 %v1341_v49, %v1333_v37 }
 0x4df   : > { %v660_v56 = vmul.f32 %v1343_v50, %v1331_v35 }
 0x4e0   : > { %v1345_v51 = vpop.eup %1344 }
 0x4e1   : > { %v659_v55 = vmul.f32 %v1345_v51, %v1337_v41  ;;  %v663_v58 = vpack.c.bf16 %v661_v53, %v660_v56  ;;  %v1128_v53 = vld [vmem:[#allocation10 + $0x9] ss:$0 sm:$0xff] }
 0x4e3   : > { %v662_v57 = vpack.c.bf16 %v659_v55, %v658_v54 }
 0x4e5   : > { %1186 = vmatprep.mubr.msk.bf16.mxu1 %vm617_vm2, %v662_v57 }
 0x4e6   : > { %1187 = vmatmul.mubr.msk.bf16.vlgmr.msra.gmra.mrb[4].mxu1 %vm617_vm2, %v663_v58 }
 0x4e7   : > { %1202 = vmatprep.mubr.msk.bf16.mxu1 %vm1580_vm1, %v1579_v24  ;;  %1199 = vmatpush3.bf16.msra.mxu1 %v1318_v31 }
 0x4e8   : > { %1200 = vmatprep.subr.bf16.mxu1 %v1579_v24 }
 0x4eb   : > { %1201 = vmatpush3.bf16.msra.mxu1 %v1319_v32 }
 0x5b9   : > { %v1188_v62 = vpop.f32.mrb[4].mxu1 }
 0x5ba   : > { %v708_v2 = vpop.f32.mrb[5].mxu1  ;;  %v729_v8 = vmul.f32 %v1188_v62, %v725_v63 }
 0x5bb   : > { %v727_v3 = vmul.f32 %v723_v61, %v708_v2  ;;  %v1189_v4 = vpop.f32.mrb[6].mxu1 }
 0x5bc   : > { %v711_v7 = vpop.f32.mrb[7].mxu1  ;;  %v730_v11 = vmul.f32 %v1189_v4, %v726_v6  ;;  %v734_v14 = vsel %vm346_vm0, %v729_v8, 0.0 }
 0x5bd   : > { %v728_v9 = vmul.f32 %v724_v0, %v711_v7  ;;  %v731_v10 = vsel %vm346_vm0, %v727_v3, 0.0 }
 0x5be   : > { %v736_v16 = vsel %vm346_vm0, %v730_v11, 0.0 }
 0x5bf   : > { %v732_v12 = vsel %vm346_vm0, %v728_v9, 0.0 }
 0x5c0   : > { %v733_v13 = vadd.f32 %v732_v12, %v731_v10 }
 0x5c2   : > { %v735_v15 = vadd.f32 %v734_v14, %v733_v13 }
 0x5c4   : > { %v737_v52 = vadd.f32 %v736_v16, %v735_v15 }
 0x5c6   : > { %v738_v17 = vpack.c.bf16 %v737_v52, %v737_v52 }
 0x5c8   : > { %1195 = vmatmul.mubr.msk.bf16.vlgmr.msra.gmra.mrb[8].mxu0 %vm346_vm0, %v738_v17 }
 0x5c9   : > { %1210 = vmatprep.mubr.msk.bf16.mxu0 %vm1580_vm1, %v1579_v24  ;;  %1207 = vmatpush3.bf16.msra.mxu0 %v1320_v42 }
 0x5ca   : > { %1208 = vmatprep.subr.bf16.mxu0 %v1579_v24 }
 0x5cd   : > { %1209 = vmatpush3.bf16.msra.mxu0 %v1321_v43 }
 0x69b   : > { %v797_v18 = vpop.f32.mrb[8].mxu0 }
 0x69c   : > { %v798_v19 = vadd.f32 %v1118_v5, %v797_v18  ;;  %v1196_v20 = vpop.f32.mrb[9].mxu0 }
 0x69d   : > { %v800_v21 = vpop.f32.mrb[10].mxu0 }
 0x69e   : > { %v803_v22 = vadd.f32 %v798_v19, %v1862_v1  ;;  %v1197_v23 = vpop.f32.mrb[11].mxu0 }
 0x6a0   : > { %v804_v25 = vsel %vm346_vm0, %v803_v22, 0.0 }
 0x6a1   : > { %805 = vadd.xlane.f32.xlu0 %v804_v25 }
 0x72e   : > { %v806_v26 = vpop.xlane.xlu0 %805 }
 0x72f   : > { %v807_v27 = vmul.f32 0.03125, %v806_v26 }
 0x731   : > { %v808_v28 = vsub.f32 %v803_v22, %v807_v27 }
 0x733   : > { %v809_v29 = vmul.f32 %v808_v28, %v808_v28 }
 0x735   : > { %v810_v30 = vsel %vm346_vm0, %v809_v29, 0.0 }
 0x736   : > { %811 = vadd.xlane.f32.xlu1 %v810_v30 }
 0x7c3   : > { %v812_v33 = vpop.xlane.xlu1 %811 }
 0x7c4   : > { %v813_v34 = vmul.f32 0.03125, %v812_v33 }
 0x7c6   : > { %v814_v1 = vadd.f32 1e-05, %v813_v34 }
 0x7c8   : > { %1346 = vrsqrt.f32 %v814_v1 }
 0x7d2   : > { %v1347_v35 = vpop.eup %1346 }
 0x7d3   : > { %v816_v37 = vmul.f32 %v1347_v35, %v808_v28 }
 0x7d5   : > { %v821_v39 = vmul.f32 %v1122_v36, %v816_v37 }
 0x7d7   : > { %v826_v40 = vadd.f32 %v1123_v38, %v821_v39 }
 0x7d9   : > { %v827_v41 = vpack.c.bf16 %v826_v40, %v826_v40 }
 0x7db   : > { %1203 = vmatmul.mubr.msk.bf16.vlgmr.msra.gmra.mrb[8].mxu1 %vm346_vm0, %v827_v41 }
 0x8ae   : > { %v886_v45 = vpop.f32.mrb[8].mxu1 }
 0x8af   : > { %v887_v46 = vadd.f32 %v1124_v44, %v886_v45  ;;  %v1204_v47 = vpop.f32.mrb[9].mxu1 }
 0x8b0   : > { %v889_v48 = vpop.f32.mrb[10].mxu1 }
 0x8b1   : > { %v892_v49 = vmax.f32 %v887_v46, 0.0  ;;  %v1205_v50 = vpop.f32.mrb[11].mxu1 }
 0x8b3   : > { %v893_v51 = vpack.c.bf16 %v892_v49, %v892_v49 }
 0x8b5   : > { %1211 = vmatmul.mubr.msk.bf16.vlgmr.msra.gmra.mrb[12].mxu0 %vm346_vm0, %v893_v51 }
 0x988   : > { %v952_v54 = vpop.f32.mrb[12].mxu0 }
 0x989   : > { %v953_v24 = vadd.f32 %v1128_v53, %v952_v54  ;;  %v1212_v55 = vpop.f32.mrb[13].mxu0 }
 0x98a   : > { %v955_v56 = vpop.f32.mrb[14].mxu0 }
 0x98b   : > { %v958_v57 = vadd.f32 %v953_v24, %v803_v22  ;;  %v1213_v58 = vpop.f32.mrb[15].mxu0 }
 0x98d   : > { %959 = vst.msk [vmem:[%s325_s14] sm:$0xff] %vm346_vm0, %v958_v57 }
 0x98e   : > { %1503 = shalt.err (!%p1500_p0)
}
 0x98f   : > { %s1504_s26 = scalar_lea.hbm %s1939_s30, 128  ;;  %s1508_s17 = scalar_lea.hbm %s1991_s6, 256 }
 0x990   : > { %p1505_p6 = scmp.ne.s32.totalorder %s1939_s30, %s1504_s26  ;;  %p1509_p8 = scmp.lt.u32.totalorder %s1939_s30, %s1991_s6 }
 0x991   : > { %p1510_p10 = scmp.lt.u32.totalorder %s1508_s17, %s1504_s26  ;;  %p1512_p7 = scmp.lt.u32.totalorder %s1504_s26, %s1939_s30 }
 0x992   : > { %p1506_p11 = pnand %p1505_p6, %p1787_p3 }
 0x993   : > { %p1511_p5 = por %p1510_p10, %p1509_p8 }
 0x994   : > { %p1507_p4 = pneg %p1506_p11 }
 0x995   : > { %p1513_p12 = por %p1512_p7, %p1511_p5 }
 0x997   : > { %p1514_p1 = pnand %p1513_p12, %p1507_p4 }
 0x999   : > { %1517 = shalt.err (!%p1514_p1)
}
 0x99a   : > { %1233 = dma.vmem_to_hbm [thread:$0]  (%p1787_p3), %s1941_s7, 128, %s1939_s30, %s961_s25  }
 0x99b PF: > { %s986_s14 = sand.u32 1, %s1556_s21   ;;  %p2011_p2 = scmp.ne.s32.totalorder %s1996_s28, 0 }
 0x99c   : > { %p2012_p13 = scmp.ge.s32.totalorder %s1568_s24, 2  ;;  %s987_s10 = scalar_lea.sflag [#allocation4], %s986_s14 }
 0x99e   : > { %p1253_p9 = pnand %p2012_p13, %p2011_p2 }
 0x9a0   : > { %1551 = dma.done.wait (!%p1253_p9), %s987_s10, 128  }
 0x9a1   : > { %1553 = vsyncadd (!%p1253_p9), %s987_s10, 4294967168  ;;  %p21_p0 = scmp.ge.s32.totalorder %s1774_s15, 4   ;;  %s2013_s21 = smov %s1560_s22 }
 0x9a2   : > { %s2014_s22 = smov %s1564_s23  ;;  %s2015_s23 = smov %s1783_s19 }
 0x9a3   : > { %s2016_s24 = smov %s1774_s15  ;;  %23 = sbr.rel (!%p21_p0) target bundleno = 7 (0x7), region = 109 }
 0x9aa   :  { %992 = vsyncpa [#allocation3], 1 }
 0x9ab   :  { %994 = vsyncpa [#allocation3 + $0x1], 1 }
 0x9ac   :  { %995 = vsyncpa [#allocation6], 1 }
 0x9ad   :  { %997 = vsyncpa [#allocation6 + $0x1], 1 }
 0x9ae   :  { %998 = vsyncpa [#allocation9], 1 }
 0x9af   :  { %999 = vsyncpa [#allocation4], 1 }
 0x9b0   :  { %1001 = vsyncpa [#allocation4 + $0x1], 1 }

</bundles_post_ra>
